<compile_context>
chip_gen: v6e
topology: v6e:2x2x1
jax: 0.10.0
libtpu: 0.0.40
codegen_flags: <defaults>
</compile_context>

<pallas_src>
import functools

import jax
import jax.numpy as jnp
from jax.experimental import pallas as pl
from jax.experimental.pallas import tpu as pltpu

_NEG_BIG = -1e30  # finite "-inf" for padded atom columns (avoids inf-inf NaNs)


def _round_up(x, m):
    return ((x + m - 1) // m) * m


def _critic_kernel(obs_ref, act_ref,
                   w1o_ref, w1a_ref, b1_ref,
                   w2_ref, b2_ref,
                   w3_ref, b3_ref, z_ref,
                   out_ref, *, q_col):
    b1 = b1_ref[...]
    b2 = b2_ref[...]
    b3 = b3_ref[...]
    z = z_ref[...]

    # Layer 1: fused "concat([obs, act]) @ W1" as two MXU dots into one
    # f32 accumulator.
    h1 = jnp.dot(obs_ref[...], w1o_ref[...], preferred_element_type=jnp.float32)
    h1 = h1 + jnp.dot(act_ref[...], w1a_ref[...], preferred_element_type=jnp.float32)
    h1 = jnp.maximum(h1 + b1, 0.0)

    # Layer 2.
    h2 = jnp.dot(h1.astype(w2_ref.dtype), w2_ref[...],
                 preferred_element_type=jnp.float32)
    h2 = jnp.maximum(h2 + b2, 0.0)

    # Output layer (lane-dense: atoms padded to a multiple of 128); padded
    # columns carry a large negative bias so the fused softmax ignores them.
    logits = jnp.dot(h2.astype(w3_ref.dtype), w3_ref[...],
                     preferred_element_type=jnp.float32) + b3

    # Fused get_q_value: softmax expectation over atoms, without materializing
    # probs (q = sum(e*z) / sum(e)); exact reciprocal on a (tb,1) vector.
    m = jnp.max(logits, axis=-1, keepdims=True)
    e = jnp.exp(logits - m)                        # padded cols underflow to 0
    s = jnp.sum(e, axis=-1, keepdims=True)
    q = jnp.sum(e * z, axis=-1, keepdims=True) * pl.reciprocal(s)

    # Pack q into the spare padded column `q_col` -> one dense full-width store.
    col = jax.lax.broadcasted_iota(jnp.int32, logits.shape, dimension=1)
    out_ref[...] = jnp.where(col == q_col, q, logits).astype(out_ref.dtype)


def prepare_params(params, z, *, compute_dtype=jnp.bfloat16):
    """Pad/cast the constant parameters ONCE (outside the jitted forward).

    Returns (prepared_tuple, num_bins).  The atom axis is padded to a multiple
    of 128 with at least one spare column, which the kernel uses to carry q.
    """
    w1o, w1a, b1, w2, b2, w3, b3 = params
    num_bins = w3.shape[1]
    nb_pad = _round_up(num_bins + 1, 128)          # +1 spare column for q
    pad_n = nb_pad - num_bins
    cd = compute_dtype
    prepared = (
        jnp.asarray(w1o, cd),
        jnp.asarray(w1a, cd),
        jnp.asarray(b1, jnp.float32).reshape(1, -1),
        jnp.asarray(w2, cd),
        jnp.asarray(b2, jnp.float32).reshape(1, -1),
        jnp.pad(jnp.asarray(w3, cd), ((0, 0), (0, pad_n))),
        jnp.pad(jnp.asarray(b3, jnp.float32).reshape(1, -1), ((0, 0), (0, pad_n)),
                constant_values=_NEG_BIG),
        jnp.pad(jnp.asarray(z, jnp.float32).reshape(1, -1), ((0, 0), (0, pad_n))),
    )
    return prepared, num_bins


@functools.partial(jax.jit,
                   static_argnames=("num_bins", "block_batch", "full_output"))
def distributional_critic_forward(obs, act, prepared, num_bins, *,
                                  block_batch=1024, full_output=False):
    """Pallas DistributionalCritic.forward (+ fused get_q_value).

    Default: returns (logits [B, num_bins], q [B, 1]).
    full_output=True: returns the raw padded (B_pad, nb_pad) buffer (q lives in
    column `num_bins`, pad columns are ~-1e30) so hot-path callers avoid the
    XLA slice copies — mask pad columns downstream.
    """
    w1o, w1a, b1, w2, b2, w3p, b3p, zp = prepared
    batch, obs_dim = obs.shape
    act_dim = act.shape[1]
    h1_dim = w1o.shape[1]
    h2_dim = w2.shape[1]
    nb_pad = w3p.shape[1]

    cd = w1o.dtype                                  # compute dtype from params
    row_mult = 16 if cd == jnp.bfloat16 else 8      # bf16 packs 2 rows/sublane

    # ---- batch tiling --------------------------------------------------------
    tb = min(block_batch, _round_up(batch, row_mult))
    # At large batch, cap the tile so the grid has >=4 steps: v7x's 2 TCs each
    # get >=2 pipelined tiles (megacore), without dropping tiles below ~128.
    cap = _round_up(pl.cdiv(batch, 4), row_mult)
    if cap >= 128:
        tb = min(tb, cap)
    b_pad = _round_up(batch, tb)
    if b_pad != batch:
        obs = jnp.pad(obs, ((0, b_pad - batch), (0, 0)))
        act = jnp.pad(act, ((0, b_pad - batch), (0, 0)))
    obs_c = obs.astype(cd)
    act_c = act.astype(cd)

    grid = (b_pad // tb,)

    def batch_spec(d):
        return pl.BlockSpec((tb, d), lambda i: (i, 0))

    def const_spec(r, c):
        # Same block every grid step -> stays resident in VMEM.
        return pl.BlockSpec((r, c), lambda i: (0, 0))

    itemsize = jnp.dtype(cd).itemsize
    flops = 2 * b_pad * (obs_dim * h1_dim + act_dim * h1_dim
                         + h1_dim * h2_dim + h2_dim * nb_pad)
    bytes_accessed = (
        itemsize * (b_pad * (obs_dim + act_dim)
                    + (obs_dim + act_dim) * h1_dim
                    + h1_dim * h2_dim + h2_dim * nb_pad)
        + 4 * (h1_dim + h2_dim + 2 * nb_pad)        # biases + z
        + 4 * b_pad * nb_pad)                       # packed logits+q output

    out_pad = pl.pallas_call(
        functools.partial(_critic_kernel, q_col=num_bins),
        out_shape=jax.ShapeDtypeStruct((b_pad, nb_pad), jnp.float32),
        grid=grid,
        in_specs=[
            batch_spec(obs_dim), batch_spec(act_dim),
            const_spec(obs_dim, h1_dim), const_spec(act_dim, h1_dim),
            const_spec(1, h1_dim),
            const_spec(h1_dim, h2_dim), const_spec(1, h2_dim),
            const_spec(h2_dim, nb_pad), const_spec(1, nb_pad),
            const_spec(1, nb_pad),
        ],
        out_specs=pl.BlockSpec((tb, nb_pad), lambda i: (i, 0)),
        compiler_params=pltpu.CompilerParams(
            dimension_semantics=("parallel",)),
        cost_estimate=pl.CostEstimate(flops=flops,
                                      transcendentals=b_pad * (nb_pad + 1),
                                      bytes_accessed=bytes_accessed),
    )(obs_c, act_c, w1o, w1a, b1, w2, b2, w3p, b3p, zp)

    if full_output:
        return out_pad
    logits = out_pad[:batch, :num_bins]
    q = out_pad[:batch, num_bins:num_bins + 1]
    return logits, q


def init_params(key, obs_dim, act_dim, net_arch=(32, 32), num_bins=51):
    """PyTorch-Linear-like uniform fan-in init; W1 pre-split into obs/act parts."""
    dims = [obs_dim + act_dim] + list(net_arch) + [num_bins]
    raw = []
    for i in range(len(dims) - 1):
        key, kw, kb = jax.random.split(key, 3)
        bound = 1.0 / jnp.sqrt(dims[i])
        w = jax.random.uniform(kw, (dims[i], dims[i + 1]), jnp.float32, -bound, bound)
        b = jax.random.uniform(kb, (1, dims[i + 1]), jnp.float32, -bound, bound)
        raw += [w, b]
    w1, b1, w2, b2, w3, b3 = raw
    return (w1[:obs_dim], w1[obs_dim:], b1, w2, b2, w3, b3)


if __name__ == "__main__":
    # Small shapes consistent with the module's forward.
    batch, obs_dim, act_dim = 8, 24, 8
    num_bins, net_arch = 51, (32, 32)
    vmin, vmax = -10.0, 10.0
    delta = (vmax - vmin) / num_bins
    z = jnp.linspace(vmin + delta / 2, vmax - delta / 2, num_bins)

    key = jax.random.PRNGKey(0)
    k_obs, k_act, k_par = jax.random.split(key, 3)
    obs = jax.random.normal(k_obs, (batch, obs_dim), jnp.float32)
    act = jax.random.normal(k_act, (batch, act_dim), jnp.float32)
    params = init_params(k_par, obs_dim, act_dim, net_arch, num_bins)

    # Pure-JAX reference (high-precision matmuls) of the same MLP + q-value.
    w1o, w1a, b1, w2, b2, w3, b3 = params
    with jax.default_matmul_precision("highest"):
        x = jnp.concatenate([obs, act], axis=-1)
        w1 = jnp.concatenate([w1o, w1a], axis=0)
        ref = jnp.maximum(x @ w1 + b1, 0.0)
        ref = jnp.maximum(ref @ w2 + b2, 0.0)
        ref_logits = ref @ w3 + b3
    ref_q = jnp.sum(jax.nn.softmax(ref_logits, axis=-1) * z, axis=-1, keepdims=True)

    # f32 compute path: tight check against the reference.
    prep32, nb = prepare_params(params, z, compute_dtype=jnp.float32)
    logits, q = distributional_critic_forward(obs, act, prep32, nb)
    logits, q = jax.block_until_ready((logits, q))
    assert logits.shape == (batch, num_bins)
    assert q.shape == (batch, 1)
    assert jnp.allclose(logits, ref_logits, atol=1e-4, rtol=1e-4)
    assert jnp.allclose(q, ref_q, atol=1e-4, rtol=1e-4)

    # bf16 compute path (default; MXU-native on v6e/v7x): looser tolerance.
    prep16, nb = prepare_params(params, z)
    logits16, q16 = distributional_critic_forward(obs, act, prep16, nb)
    logits16, q16 = jax.block_until_ready((logits16, q16))
    assert jnp.allclose(logits16, ref_logits, atol=1.5e-1, rtol=5e-2)
    assert jnp.allclose(q16, ref_q, atol=1.5e-1, rtol=5e-2)

    print("KERNEL_OK")
</pallas_src>

<mosaic_0001>
module attributes {stable_mosaic.version = 11 : i64} {
  func.func @_critic_kernel(%arg0: i32, %arg1: memref<8x24xf32, #tpu.memory_space<vmem>>, %arg2: memref<8x8xf32, #tpu.memory_space<vmem>>, %arg3: memref<24x32xf32, #tpu.memory_space<vmem>>, %arg4: memref<8x32xf32, #tpu.memory_space<vmem>>, %arg5: memref<1x32xf32, #tpu.memory_space<vmem>>, %arg6: memref<32x32xf32, #tpu.memory_space<vmem>>, %arg7: memref<1x32xf32, #tpu.memory_space<vmem>>, %arg8: memref<32x128xf32, #tpu.memory_space<vmem>>, %arg9: memref<1x128xf32, #tpu.memory_space<vmem>>, %arg10: memref<1x128xf32, #tpu.memory_space<vmem>>, %arg11: memref<8x128xf32, #tpu.memory_space<vmem>>) attributes {dimension_semantics = [#tpu.dimension_semantics<parallel>], iteration_bounds = array<i64: 1>, scalar_prefetch = 0 : i64, scratch_operands = 0 : i64, tpu.core_type = #tpu.core_type<tc>, window_params = [{transform_indices = @transform_0, window_bounds = array<i64: 8, 24>}, {transform_indices = @transform_1, window_bounds = array<i64: 8, 8>}, {pipeline_mode = #tpu.pipeline_mode<synchronous>, transform_indices = @transform_2, window_bounds = array<i64: 24, 32>}, {pipeline_mode = #tpu.pipeline_mode<synchronous>, transform_indices = @transform_3, window_bounds = array<i64: 8, 32>}, {pipeline_mode = #tpu.pipeline_mode<synchronous>, transform_indices = @transform_4, window_bounds = array<i64: 1, 32>}, {pipeline_mode = #tpu.pipeline_mode<synchronous>, transform_indices = @transform_5, window_bounds = array<i64: 32, 32>}, {pipeline_mode = #tpu.pipeline_mode<synchronous>, transform_indices = @transform_6, window_bounds = array<i64: 1, 32>}, {pipeline_mode = #tpu.pipeline_mode<synchronous>, transform_indices = @transform_7, window_bounds = array<i64: 32, 128>}, {pipeline_mode = #tpu.pipeline_mode<synchronous>, transform_indices = @transform_8, window_bounds = array<i64: 1, 128>}, {pipeline_mode = #tpu.pipeline_mode<synchronous>, transform_indices = @transform_9, window_bounds = array<i64: 1, 128>}, {transform_indices = @transform_10, window_bounds = array<i64: 8, 128>}]} {
    %c0 = arith.constant 0 : index
    %c0_0 = arith.constant 0 : index
    %0 = vector.load %arg5[%c0, %c0_0] : memref<1x32xf32, #tpu.memory_space<vmem>>, vector<1x32xf32>
    %c0_1 = arith.constant 0 : index
    %c0_2 = arith.constant 0 : index
    %1 = vector.load %arg7[%c0_1, %c0_2] : memref<1x32xf32, #tpu.memory_space<vmem>>, vector<1x32xf32>
    %c0_3 = arith.constant 0 : index
    %c0_4 = arith.constant 0 : index
    %2 = vector.load %arg9[%c0_3, %c0_4] : memref<1x128xf32, #tpu.memory_space<vmem>>, vector<1x128xf32>
    %c0_5 = arith.constant 0 : index
    %c0_6 = arith.constant 0 : index
    %3 = vector.load %arg10[%c0_5, %c0_6] : memref<1x128xf32, #tpu.memory_space<vmem>>, vector<1x128xf32>
    %c0_7 = arith.constant 0 : index
    %c0_8 = arith.constant 0 : index
    %4 = vector.load %arg1[%c0_7, %c0_8] : memref<8x24xf32, #tpu.memory_space<vmem>>, vector<8x24xf32>
    %c0_9 = arith.constant 0 : index
    %c0_10 = arith.constant 0 : index
    %5 = vector.load %arg3[%c0_9, %c0_10] : memref<24x32xf32, #tpu.memory_space<vmem>>, vector<24x32xf32>
    %cst = arith.constant dense<0.000000e+00> : vector<8x32xf32>
    %6 = tpu.matmul %4, %5, %cst {dimension_numbers = #tpu.dot_dimension_numbers<[1], [0], [0], [1], [0, 0, 1, 1], [], []>} : vector<8x24xf32>, vector<24x32xf32>, vector<8x32xf32> -> vector<8x32xf32>
    %c0_11 = arith.constant 0 : index
    %c0_12 = arith.constant 0 : index
    %7 = vector.load %arg2[%c0_11, %c0_12] : memref<8x8xf32, #tpu.memory_space<vmem>>, vector<8x8xf32>
    %c0_13 = arith.constant 0 : index
    %c0_14 = arith.constant 0 : index
    %8 = vector.load %arg4[%c0_13, %c0_14] : memref<8x32xf32, #tpu.memory_space<vmem>>, vector<8x32xf32>
    %cst_15 = arith.constant dense<0.000000e+00> : vector<8x32xf32>
    %9 = tpu.matmul %7, %8, %cst_15 {dimension_numbers = #tpu.dot_dimension_numbers<[1], [0], [0], [1], [0, 0, 1, 1], [], []>} : vector<8x8xf32>, vector<8x32xf32>, vector<8x32xf32> -> vector<8x32xf32>
    %10 = arith.addf %6, %9 : vector<8x32xf32>
    %11 = vector.broadcast %0 : vector<1x32xf32> to vector<8x32xf32>
    %12 = arith.addf %10, %11 : vector<8x32xf32>
    %cst_16 = arith.constant 0.000000e+00 : f32
    %13 = vector.broadcast %cst_16 : f32 to vector<8x32xf32>
    %14 = arith.maximumf %12, %13 : vector<8x32xf32>
    %c0_17 = arith.constant 0 : index
    %c0_18 = arith.constant 0 : index
    %15 = vector.load %arg6[%c0_17, %c0_18] : memref<32x32xf32, #tpu.memory_space<vmem>>, vector<32x32xf32>
    %cst_19 = arith.constant dense<0.000000e+00> : vector<8x32xf32>
    %16 = tpu.matmul %14, %15, %cst_19 {dimension_numbers = #tpu.dot_dimension_numbers<[1], [0], [0], [1], [0, 0, 1, 1], [], []>} : vector<8x32xf32>, vector<32x32xf32>, vector<8x32xf32> -> vector<8x32xf32>
    %17 = vector.broadcast %1 : vector<1x32xf32> to vector<8x32xf32>
    %18 = arith.addf %16, %17 : vector<8x32xf32>
    %cst_20 = arith.constant 0.000000e+00 : f32
    %19 = vector.broadcast %cst_20 : f32 to vector<8x32xf32>
    %20 = arith.maximumf %18, %19 : vector<8x32xf32>
    %c0_21 = arith.constant 0 : index
    %c0_22 = arith.constant 0 : index
    %21 = vector.load %arg8[%c0_21, %c0_22] : memref<32x128xf32, #tpu.memory_space<vmem>>, vector<32x128xf32>
    %cst_23 = arith.constant dense<0.000000e+00> : vector<8x128xf32>
    %22 = tpu.matmul %20, %21, %cst_23 {dimension_numbers = #tpu.dot_dimension_numbers<[1], [0], [0], [1], [0, 0, 1, 1], [], []>} : vector<8x32xf32>, vector<32x128xf32>, vector<8x128xf32> -> vector<8x128xf32>
    %23 = vector.broadcast %2 : vector<1x128xf32> to vector<8x128xf32>
    %24 = arith.addf %22, %23 : vector<8x128xf32>
    %cst_24 = arith.constant dense<0xFF800000> : vector<8xf32>
    %25 = vector.multi_reduction <maximumf>, %24, %cst_24 [1] : vector<8x128xf32> to vector<8xf32>
    %26 = vector.shape_cast %25 : vector<8xf32> to vector<8x1xf32>
    %27 = vector.broadcast %26 : vector<8x1xf32> to vector<8x128xf32>
    %28 = arith.subf %24, %27 : vector<8x128xf32>
    %29 = math.exp %28 : vector<8x128xf32>
    %cst_25 = arith.constant dense<0.000000e+00> : vector<8xf32>
    %30 = vector.multi_reduction <add>, %29, %cst_25 [1] : vector<8x128xf32> to vector<8xf32>
    %31 = vector.shape_cast %30 : vector<8xf32> to vector<8x1xf32>
    %32 = vector.broadcast %3 : vector<1x128xf32> to vector<8x128xf32>
    %33 = arith.mulf %29, %32 : vector<8x128xf32>
    %cst_26 = arith.constant dense<0.000000e+00> : vector<8xf32>
    %34 = vector.multi_reduction <add>, %33, %cst_26 [1] : vector<8x128xf32> to vector<8xf32>
    %35 = vector.shape_cast %34 : vector<8xf32> to vector<8x1xf32>
    %36 = tpu.reciprocal %31 : vector<8x1xf32> -> vector<8x1xf32>
    %37 = arith.mulf %35, %36 : vector<8x1xf32>
    %38 = tpu.iota {dimensions = array<i32: 1>} : vector<8x128xi32>
    %c51_i32 = arith.constant 51 : i32
    %39 = vector.broadcast %c51_i32 : i32 to vector<8x128xi32>
    %40 = arith.cmpi eq, %38, %39 : vector<8x128xi32>
    %41 = vector.shape_cast %37 : vector<8x1xf32> to vector<8x1xf32>
    %42 = vector.broadcast %41 : vector<8x1xf32> to vector<8x128xf32>
    %43 = arith.select %40, %42, %24 : vector<8x128xi1>, vector<8x128xf32>
    %c0_27 = arith.constant 0 : index
    %c0_28 = arith.constant 0 : index
    %44 = vector.load %arg11[%c0_27, %c0_28] : memref<8x128xf32, #tpu.memory_space<vmem>>, vector<8x128xf32>
    tpu.vector_store %arg11[%c0_27, %c0_28], %43 {strides = array<i32>} : memref<8x128xf32, #tpu.memory_space<vmem>>, vector<8x128xf32>,
    return
  }
  func.func @transform_0(%arg0: i32) -> (i32, i32) {
    %c0_i32 = arith.constant 0 : i32
    %c0_i32_0 = arith.constant 0 : i32
    return %arg0, %c0_i32 : i32, i32
  }
  func.func @transform_1(%arg0: i32) -> (i32, i32) {
    %c0_i32 = arith.constant 0 : i32
    %c0_i32_0 = arith.constant 0 : i32
    return %arg0, %c0_i32 : i32, i32
  }
  func.func @transform_2(%arg0: i32) -> (i32, i32) {
    %c0_i32 = arith.constant 0 : i32
    %c0_i32_0 = arith.constant 0 : i32
    %c0_i32_1 = arith.constant 0 : i32
    return %c0_i32, %c0_i32_0 : i32, i32
  }
  func.func @transform_3(%arg0: i32) -> (i32, i32) {
    %c0_i32 = arith.constant 0 : i32
    %c0_i32_0 = arith.constant 0 : i32
    %c0_i32_1 = arith.constant 0 : i32
    return %c0_i32, %c0_i32_0 : i32, i32
  }
  func.func @transform_4(%arg0: i32) -> (i32, i32) {
    %c0_i32 = arith.constant 0 : i32
    %c0_i32_0 = arith.constant 0 : i32
    %c0_i32_1 = arith.constant 0 : i32
    return %c0_i32, %c0_i32_0 : i32, i32
  }
  func.func @transform_5(%arg0: i32) -> (i32, i32) {
    %c0_i32 = arith.constant 0 : i32
    %c0_i32_0 = arith.constant 0 : i32
    %c0_i32_1 = arith.constant 0 : i32
    return %c0_i32, %c0_i32_0 : i32, i32
  }
  func.func @transform_6(%arg0: i32) -> (i32, i32) {
    %c0_i32 = arith.constant 0 : i32
    %c0_i32_0 = arith.constant 0 : i32
    %c0_i32_1 = arith.constant 0 : i32
    return %c0_i32, %c0_i32_0 : i32, i32
  }
  func.func @transform_7(%arg0: i32) -> (i32, i32) {
    %c0_i32 = arith.constant 0 : i32
    %c0_i32_0 = arith.constant 0 : i32
    %c0_i32_1 = arith.constant 0 : i32
    return %c0_i32, %c0_i32_0 : i32, i32
  }
  func.func @transform_8(%arg0: i32) -> (i32, i32) {
    %c0_i32 = arith.constant 0 : i32
    %c0_i32_0 = arith.constant 0 : i32
    %c0_i32_1 = arith.constant 0 : i32
    return %c0_i32, %c0_i32_0 : i32, i32
  }
  func.func @transform_9(%arg0: i32) -> (i32, i32) {
    %c0_i32 = arith.constant 0 : i32
    %c0_i32_0 = arith.constant 0 : i32
    %c0_i32_1 = arith.constant 0 : i32
    return %c0_i32, %c0_i32_0 : i32, i32
  }
  func.func @transform_10(%arg0: i32) -> (i32, i32) {
    %c0_i32 = arith.constant 0 : i32
    %c0_i32_0 = arith.constant 0 : i32
    return %arg0, %c0_i32 : i32, i32
  }
}

</mosaic_0001>

<bundles_post_ra>
// kernel: distributional_critic_forward.1
= control target key start
LH: loop header
LB: loop body
LE: loop exit
PB: predicated region body
PF: predicated region fallthrough
CT: control target
= control target key end

     0   :  { %15 = vsyncpa [#allocation3], 0  ;;  %s782_s0 = inlined_call_operand.hbm [shape: f32[8,24], index: 0, kind: input, shape index: {}]   ;;  %s783_s1 = inlined_call_operand.hbm [shape: f32[8,8], index: 1, kind: input, shape index: {}]   ;;  %s784_s2 = inlined_call_operand.hbm [shape: f32[24,32], index: 2, kind: input, shape index: {}]   ;;  %s785_s3 = inlined_call_operand.hbm [shape: f32[8,32], index: 3, kind: input, shape index: {}]   ;;  %s786_s4 = inlined_call_operand.vmem [shape: f32[1,32], index: 4, kind: input, shape index: {}]   ;;  %s787_s5 = inlined_call_operand.hbm [shape: f32[32,32], index: 5, kind: input, shape index: {}]   ;;  %s788_s6 = inlined_call_operand.vmem [shape: f32[1,32], index: 6, kind: input, shape index: {}]   ;;  %s789_s7 = inlined_call_operand.hbm [shape: f32[32,128], index: 7, kind: input, shape index: {}]   ;;  %s790_s8 = inlined_call_operand.vmem [shape: f32[1,128], index: 8, kind: input, shape index: {}]   ;;  %s791_s9 = inlined_call_operand.vmem [shape: f32[1,128], index: 9, kind: input, shape index: {}]   ;;  %s792_s10 = inlined_call_operand.vmem [shape: f32[8,128], index: 10, kind: output, shape index: {}]  }
   0x1   :  { %16 = vsyncpa [#allocation5], 0 }
   0x2   :  { %17 = vsyncpa [#allocation8], 0 }
   0x3   :  { %18 = vsyncpa [#allocation11], 0  ;;  %s678_s13 = smov [#allocation4]   ;;  %s679_s15 = smov [#allocation7]  }
   0x4   :  { %s35_s14 = sshll.u32 %s678_s13, 4  ;;  %s57_s16 = sshll.u32 %s679_s15, 4  ;;  %s36_s14 = int_to_ptr.vmem [resolvable:$true] %s35_s14  ;;  %s58_s16 = int_to_ptr.vmem [resolvable:$true] %s57_s16 }
   0x5   :  { %s558_s17 = scalar_lea.vmem %s36_s14, 128  ;;  %p563_p1 = scmp.lt.s32.totalorder %s36_s14, %s36_s14 }
   0x6   :  { %p559_p0 = scmp.ne.s32.totalorder %s36_s14, %s558_s17  ;;  %p564_p2 = scmp.lt.s32.totalorder %s558_s17, %s558_s17 }
   0x8   :  { %p565_p3 = por %p564_p2, %p563_p1 }
   0xa   :  { %p566_p4 = pnand %p565_p3, %p559_p0 }
   0xc   :  { %569 = shalt.err (!%p566_p4)
}
   0xd   :  { %38 = dma.hbm_to_vmem [thread:$0]  %s783_s1, 128, %s36_s14, [#allocation5]  }
   0xe   :  { %s578_s20 = scalar_lea.vmem %s58_s16, 128  ;;  %p583_p6 = scmp.lt.s32.totalorder %s58_s16, %s58_s16 }
   0xf   :  { %p579_p5 = scmp.ne.s32.totalorder %s58_s16, %s578_s20  ;;  %p584_p7 = scmp.lt.s32.totalorder %s578_s20, %s578_s20 }
  0x11   :  { %p585_p8 = por %p584_p7, %p583_p6 }
  0x13   :  { %p586_p9 = pnand %p585_p8, %p579_p5 }
  0x15   :  { %589 = shalt.err (!%p586_p9)
}
  0x16   :  { %60 = dma.hbm_to_vmem [thread:$0]  %s785_s3, 128, %s58_s16, [#allocation8]  }
  0x17   :  { %s680_s23 = smov [#allocation2]   ;;  %s681_s25 = smov [#allocation6]  }
  0x18   :  { %s25_s24 = sshll.u32 %s680_s23, 4  ;;  %s44_s26 = sshll.u32 %s681_s25, 4  ;;  %s26_s24 = int_to_ptr.vmem [resolvable:$true] %s25_s24  ;;  %s45_s26 = int_to_ptr.vmem [resolvable:$true] %s44_s26 }
  0x19   :  { %s598_s27 = scalar_lea.vmem %s26_s24, 128  ;;  %p603_p11 = scmp.lt.s32.totalorder %s26_s24, %s26_s24 }
  0x1a   :  { %p599_p10 = scmp.ne.s32.totalorder %s26_s24, %s598_s27  ;;  %p604_p12 = scmp.lt.s32.totalorder %s598_s27, %s598_s27 }
  0x1c   :  { %p605_p13 = por %p604_p12, %p603_p11 }
  0x1e   :  { %p606_p0 = pnand %p605_p13, %p599_p10 }
  0x20   :  { %609 = shalt.err (!%p606_p0)
}
  0x21   :  { %28 = dma.hbm_to_vmem [thread:$0]  %s782_s0, 128, %s26_s24, [#allocation3]  }
  0x22   :  { %s618_s29 = scalar_lea.vmem %s45_s26, 384  ;;  %p623_p2 = scmp.lt.s32.totalorder %s45_s26, %s45_s26 }
  0x23   :  { %p619_p1 = scmp.ne.s32.totalorder %s45_s26, %s618_s29  ;;  %p624_p3 = scmp.lt.s32.totalorder %s618_s29, %s618_s29 }
  0x25   :  { %p625_p4 = por %p624_p3, %p623_p2 }
  0x27   :  { %p626_p5 = pnand %p625_p4, %p619_p1 }
  0x29   :  { %629 = shalt.err (!%p626_p5)
}
  0x2a   :  { %s682_s3 = smov 128   ;;  %s683_s30 = smov 8  }
  0x2b   :  { %50 = dma.hbm_to_vmem [thread:$0]  %s784_s2, 384, %s45_s26, [#allocation5], %s682_s3, %s682_s3, %s683_s30  }
  0x2c   :  { %s684_s13 = smov [#allocation9]   ;;  %s685_s15 = smov [#allocation10]  }
  0x2d   :  { %s68_s14 = sshll.u32 %s684_s13, 4  ;;  %s82_s16 = sshll.u32 %s685_s15, 4  ;;  %s69_s14 = int_to_ptr.vmem [resolvable:$true] %s68_s14  ;;  %s83_s16 = int_to_ptr.vmem [resolvable:$true] %s82_s16 }
  0x2e   :  { %s638_s0 = scalar_lea.vmem %s69_s14, 512  ;;  %p643_p7 = scmp.lt.s32.totalorder %s69_s14, %s69_s14 }
  0x2f   :  { %p639_p6 = scmp.ne.s32.totalorder %s69_s14, %s638_s0  ;;  %p644_p8 = scmp.lt.s32.totalorder %s638_s0, %s638_s0 }
  0x31   :  { %p645_p9 = por %p644_p8, %p643_p7 }
  0x33   :  { %p646_p10 = pnand %p645_p9, %p639_p6 }
  0x35   :  { %649 = shalt.err (!%p646_p10)
}
  0x36   :  { %74 = dma.hbm_to_vmem [thread:$0]  %s787_s5, 512, %s69_s14, [#allocation8], %s682_s3, %s682_s3, %s683_s30  }
  0x37   :  { %s658_s19 = scalar_lea.vmem %s83_s16, 512  ;;  %p663_p12 = scmp.lt.s32.totalorder %s83_s16, %s83_s16 }
  0x38   :  { %p659_p11 = scmp.ne.s32.totalorder %s83_s16, %s658_s19  ;;  %p664_p13 = scmp.lt.s32.totalorder %s658_s19, %s658_s19 }
  0x3a   :  { %p665_p0 = por %p664_p13, %p663_p12 }
  0x3c   :  { %p666_p1 = pnand %p665_p0, %p659_p11 }
  0x3e   :  { %669 = shalt.err (!%p666_p1)
}
  0x3f   :  { %88 = dma.hbm_to_vmem [thread:$0]  %s789_s7, 512, %s83_s16, [#allocation11], %s682_s3, %s682_s3, %s683_s30  }
  0x40   :  { %670 = dma.done.wait [#allocation3], 128  }
  0x41   :  { %671 = vsyncadd [#allocation3], 4294967168 }
  0x42   :  { %672 = dma.done.wait [#allocation5], 512  }
  0x43   :  { %673 = vsyncadd [#allocation5], 4294966784 }
  0x44   :  { %674 = dma.done.wait [#allocation8], 640  }
  0x45   :  { %675 = vsyncadd [#allocation8], 4294966656 }
  0x46   :  { %676 = dma.done.wait [#allocation11], 512  }
  0x47   :  { %677 = vsyncadd [#allocation11], 4294966784  ;;  %v686_v0 = vmov 0.0   ;;  %vm687_vm0 = vmmov 0   ;;  %vm121_vm1 = vcmask 64512   ;;  %v118_v1 = vld [vmem:[#allocation6 + $0x10] sm:$0xff]  ;;  %v463_v39 = vlaneseq }
  0x48   :  { %505 = vmatprep.subr.mxu1 %v686_v0  ;;  %500 = vmatprep.subr.mxu0 %v686_v0  ;;  %v120_v2 = vld [vmem:[#allocation7] sm:$0xff]  ;;  %v117_v3 = vld [vmem:[#allocation6 + $0x8] sm:$0xff]  ;;  %v116_v5 = vld [vmem:[#allocation6] sm:$0xff]  ;;  %vm195_vm2 = vcmask 195584   ;;  %vm287_vm3 = vcmask 261120  }
  0x49   :  { %502 = vmatprep.mubr.msk.f32.mxu0 %vm687_vm0, %v686_v0  ;;  %511 = vmatprep.mubr.msk.f32.mxu1 %vm687_vm0, %v686_v0  ;;  %v119_v4 = vld [vmem:[#allocation4] sm:$0xff]  ;;  %v115_v6 = vld [vmem:[#allocation2] sm:$0xff]  ;;  %v278_v9 = vld [vmem:[#allocation9 + $0x8] sm:$0xff]  ;;  %v464_v40 = vand.u32 127, %v463_v39 }
  0x4a   :  { %506 = vmatpush3.msra.mxu1 %v118_v1  ;;  %501 = vmatpush3.msra.mxu0 %v120_v2  ;;  %v280_v7 = vld [vmem:[#allocation9 + $0x18] sm:$0xff]  ;;  %v279_v8 = vld [vmem:[#allocation9 + $0x10] sm:$0xff]  ;;  %v277_v10 = vld [vmem:[#allocation9] sm:$0xff] }
  0x4b   :  { %507 = vmatprep.subr.mxu1 %v686_v0  ;;  %503 = vmatmul.mubr.msk.f32.vlgmr.msra.gmra.mxu0 %vm121_vm1, %v119_v4  ;;  %v365_v11 = vld [vmem:[#allocation10 + $0x18] sm:$0xff]  ;;  %v478_v14 = vld [vmem:[%s786_s4] ss:$0 sm:$0xff]  ;;  %v363_v21 = vld [vmem:[#allocation10 + $0x8] sm:$0xff]  ;;  %vm465_vm4 = vcmp.eq.s32.totalorder %v464_v40, 51 }
  0x4c   :  { %508 = vmatpush3.msra.mxu1 %v117_v3  ;;  %514 = vmatprep.subr.mxu0 %v686_v0  ;;  %v364_v20 = vld [vmem:[#allocation10 + $0x10] sm:$0xff]  ;;  %v362_v22 = vld [vmem:[#allocation10] sm:$0xff] }
  0x4d   :  { %509 = vmatprep.subr.mxu1 %v686_v0  ;;  %522 = vmatprep.mubr.msk.f32.mxu0 %vm687_vm0, %v686_v0  ;;  %v479_v23 = vld [vmem:[%s788_s6] ss:$0 sm:$0xff] }
  0x4e   :  { %510 = vmatpush3.msra.mxu1 %v116_v5  ;;  %515 = vmatpush3.msra.mxu0 %v280_v7  ;;  %v481_v28 = vld [vmem:[%s790_s8] ss:$0 sm:$0xff] }
  0x4f   :  { %512 = vmatmul.mubr.msk.f32.vlgmr.msra.gmra.mxu1 %vm195_vm2, %v115_v6  ;;  %525 = vmatprep.subr.mxu1 %v686_v0  ;;  %v483_v35 = vld [vmem:[%s791_s9] ss:$0 sm:$0xff] }
  0x50   :  { %533 = vmatprep.mubr.msk.f32.mxu1 %vm687_vm0, %v686_v0  ;;  %516 = vmatprep.subr.mxu0 %v686_v0 }
  0x51   :  { %517 = vmatpush3.msra.mxu0 %v279_v8  ;;  %526 = vmatpush3.msra.mxu1 %v365_v11 }
  0x52   :  { %518 = vmatprep.subr.mxu0 %v686_v0  ;;  %527 = vmatprep.subr.mxu1 %v686_v0 }
  0x53   :  { %519 = vmatpush3.msra.mxu0 %v278_v9  ;;  %528 = vmatpush3.msra.mxu1 %v364_v20 }
  0x54   :  { %520 = vmatprep.subr.mxu0 %v686_v0  ;;  %529 = vmatprep.subr.mxu1 %v686_v0 }
  0x55   :  { %521 = vmatpush3.msra.mxu0 %v277_v10  ;;  %530 = vmatpush3.msra.mxu1 %v363_v21 }
  0x56   :  { %531 = vmatprep.subr.mxu1 %v686_v0 }
  0x57   :  { %532 = vmatpush3.msra.mxu1 %v362_v22 }
 0x10b   :  { %v191_v12 = vpop.f32.mrf.mxu0 }
 0x10d   :  { %v504_v13 = vpop.f32.mrf.mxu0 }
 0x10f   :  { %v265_v15 = vpop.f32.mrf.mxu1 }
 0x110   :  { %v266_v16 = vadd.f32 %v265_v15, %v191_v12 }
 0x111   :  { %v513_v17 = vpop.f32.mrf.mxu1 }
 0x112   :  { %v275_v18 = vadd.f32 %v478_v14, %v266_v16 }
 0x114   :  { %v276_v19 = vmax.f32 %v275_v18, 0.0 }
 0x116   :  { %523 = vmatmul.mubr.msk.f32.vlgmr.msra.gmra.mxu0 %vm287_vm3, %v276_v19 }
 0x1d6   :  { %v357_v24 = vpop.f32.mrf.mxu0 }
 0x1d7   :  { %v358_v25 = vadd.f32 %v479_v23, %v357_v24 }
 0x1d8   :  { %v524_v26 = vpop.f32.mrf.mxu0 }
 0x1d9   :  { %v361_v27 = vmax.f32 %v358_v25, 0.0 }
 0x1db   :  { %534 = vmatmul.mubr.msk.f32.vlgmr.msra.gmra.mxu1 %vm287_vm3, %v361_v27 }
 0x29b   :  { %v441_v29 = vpop.f32.mrf.mxu1 }
 0x29c   :  { %v442_v30 = vadd.f32 %v481_v28, %v441_v29 }
 0x29d   :  { %v535_v31 = vpop.f32.mrf.mxu1 }
 0x29e   :  { %445 = vmax.xlane.f32.xlu0 %v442_v30 }
 0x327   :  { %v446_v32 = vpop.xlane.xlu0 %445 }
 0x328   :  { %v447_v33 = vsub.f32 %v442_v30, %v446_v32 }
 0x32a   :  { %v448_v34 = vmul.f32 1.442695, %v447_v33 }
 0x32c   :  { %546 = vpow2.f32 %v448_v34 }
 0x339   :  { %v547_v36 = vpop.eup %546 }
 0x33a   :  { %450 = vadd.xlane.f32.xlu0 %v547_v36  ;;  %v458_v37 = vmul.f32 %v547_v36, %v483_v35 }
 0x33c   :  { %459 = vadd.xlane.f32.xlu1 %v458_v37 }
 0x3c3   :  { %v451_v38 = vpop.xlane.xlu0 %450 }
 0x3c4   :  { %548 = vrcp.f32 %v451_v38 }
 0x3c5   :  { %v460_v42 = vpop.xlane.xlu1 %459 }
 0x3d1   :  { %v549_v41 = vpop.eup %548 }
 0x3d2   :  { %v462_v43 = vmul.f32 %v549_v41, %v460_v42 }
 0x3d4   :  { %v466_v44 = vsel %vm465_vm4, %v462_v43, %v442_v30 }
 0x3d5   :  { %467 = vst [vmem:[%s792_s10] sm:$0xff] %v466_v44 }
 0x3d6   :  { %472 = vsyncpa [#allocation3], 1 }
 0x3d7   :  { %473 = vsyncpa [#allocation5], 1 }
 0x3d8   :  { %474 = vsyncpa [#allocation8], 1 }
 0x3d9   :  { %475 = vsyncpa [#allocation11], 1 }

</bundles_post_ra>
